<compile_context>
chip_gen: v7x
topology: tpu7x:2x2x1
jax: 0.10.0
libtpu: 0.0.40
codegen_flags: <defaults>
</compile_context>

<pallas_src>
import jax
import jax.numpy as jnp
from jax.experimental import pallas as pl
from jax.experimental.pallas import tpu as pltpu


def encoder_kernel(tok_ref, emb_ref, wih_ref, bg_ref, whh_ref, bhn_ref, out_ref, hid_ref):
    """Fused embedding + input projection + GRU recurrence, single invocation (no grid).

    tok_ref : (T*B, 1) int32, time-major (row n = t*B + b).
    emb_ref : (V, E)   f32 embedding table.
    wih_ref : (E, 3*GP) f32, W_ih^T per gate at lane blocks [0, GP, 2*GP] (gate order r,z,n).
    bg_ref  : (1, 3*GP) f32, b_ih (+ b_hh for r,z) at the same lane blocks.
    whh_ref : (H, 3*GP) f32, W_hh^T per gate at the same lane blocks.
    bhn_ref : (1, H)    f32, b_hn (must stay inside the r*(...) term).
    out_ref : (B, T, H) per-step hidden states, batch_first.
    hid_ref : (B, H)    final hidden state.
    """
    B, T, H = out_ref.shape
    N = tok_ref.shape[0]           # T * B
    V = emb_ref.shape[0]
    GP = whh_ref.shape[1] // 3     # per-gate lane padding (128)

    # ---- fused embedding lookup: one-hot (N,V) @ (V,E) on the MXU ----
    lane_id = jax.lax.broadcasted_iota(jnp.int32, (N, V), 1)
    onehot = jnp.where(tok_ref[...] == lane_id, 1.0, 0.0).astype(jnp.float32)
    x = jnp.dot(onehot, emb_ref[...], preferred_element_type=jnp.float32)          # (N, E)

    # ---- hoisted input projection for all (t,b): one matmul, gates lane-padded ----
    gi = jnp.dot(x, wih_ref[...], preferred_element_type=jnp.float32) + bg_ref[...]  # (N, 3*GP)

    w_all = whh_ref[...]                                   # (H, 3*GP), loaded once
    b_hn = jnp.broadcast_to(bhn_ref[...], (B, H))          # hoisted: no per-step broadcast

    # T is small and static -> fully unrolled straight-line code; h stays in vregs.
    h = jnp.zeros((B, H), jnp.float32)
    for t in range(T):
        gi_t = gi[t * B:(t + 1) * B, :]                    # (B, 3*GP); independent of h
        # Single recurrent matmul per step (all 3 gates in one MXU push).
        gh = jnp.dot(h, w_all, preferred_element_type=jnp.float32)   # (B, 3*GP)

        r = jax.nn.sigmoid(gi_t[:, 0:H] + gh[:, 0:H])
        z = jax.nn.sigmoid(gi_t[:, GP:GP + H] + gh[:, GP:GP + H])
        n = jnp.tanh(gi_t[:, 2 * GP:2 * GP + H] + r * (gh[:, 2 * GP:2 * GP + H] + b_hn))
        h = n + z * (h - n)                                # == (1-z)*n + z*h

        out_ref[:, t, :] = h.astype(out_ref.dtype)         # batch_first store (static index)

    hid_ref[...] = h.astype(hid_ref.dtype)                 # final hidden written exactly once


def encoder_forward(tokens, emb_table, w_ih, w_hh, b_ih, b_hh):
    """tokens: (B, T) int32. Returns (output (B, T, H), hidden (1, B, H)) like nn.GRU."""
    B, T = tokens.shape
    V, E = emb_table.shape
    H = w_hh.shape[1]
    GP = ((H + 127) // 128) * 128      # pad each gate to its own 128-lane block
    f32 = jnp.float32

    def pad_gate(blk):                 # (D, H) -> (D, GP), zero-padded lanes
        return jnp.concatenate([blk, jnp.zeros((blk.shape[0], GP - H), f32)], axis=1)

    # -------- parameter packing (param-sized; activations never leave the kernel) --------
    # PyTorch gate order along the 3H axis is (r, z, n); pre-transpose so x @ w = x @ W^T.
    w_ih_g = w_ih.reshape(3, H, E).astype(f32)
    w_hh_g = w_hh.reshape(3, H, H).astype(f32)
    w_ih_p = jnp.concatenate([pad_gate(w_ih_g[g].T) for g in range(3)], axis=1)   # (E, 3*GP)
    w_hh_p = jnp.concatenate([pad_gate(w_hh_g[g].T) for g in range(3)], axis=1)   # (H, 3*GP)

    b_ih_g = b_ih.reshape(3, H).astype(f32)
    b_hh_g = b_hh.reshape(3, H).astype(f32)
    # r,z gates: fold b_ih + b_hh; n gate: only b_ih (b_hn stays inside the r*(...) term).
    bg = jnp.concatenate([pad_gate((b_ih_g[0] + b_hh_g[0])[None, :]),
                          pad_gate((b_ih_g[1] + b_hh_g[1])[None, :]),
                          pad_gate(b_ih_g[2][None, :])], axis=1)                   # (1, 3*GP)
    b_hn = b_hh_g[2][None, :]                                                      # (1, H)

    # Time-major token column so gi rows [t*B:(t+1)*B] are exactly the step-t slab.
    tok_col = tokens.T.reshape(T * B, 1).astype(jnp.int32)

    vmem = pl.BlockSpec(memory_space=pltpu.MemorySpace.VMEM)
    # No grid: single invocation, everything VMEM-resident (a few tens of KB << VMEM on
    # v5e/v6e/v7x), one HBM DMA per input and one per output.
    # v7x note: for large batches, add a leading grid axis over batch chunks with
    # dimension_semantics=("parallel",) to use both TensorCores; pointless at B=2.
    out, hid = pl.pallas_call(
        encoder_kernel,
        out_shape=(jax.ShapeDtypeStruct((B, T, H), f32),
                   jax.ShapeDtypeStruct((B, H), f32)),
        in_specs=[vmem] * 6,
        out_specs=(vmem, vmem),
    )(tok_col, emb_table.astype(f32), w_ih_p, bg, w_hh_p, b_hn)

    return out, hid[None, :, :]        # ((B,T,H) batch_first, (1,B,H) final hidden)


def reference_forward(tokens, emb_table, w_ih, w_hh, b_ih, b_hh):
    """Pure-JAX reference of nn.Embedding + nn.GRU forward (exact-f32 matmuls)."""
    hp = jax.lax.Precision.HIGHEST
    x = jnp.take(emb_table, tokens, axis=0)                # (B, T, E)
    B, T, E = x.shape
    H = w_hh.shape[1]
    h = jnp.zeros((B, H), jnp.float32)
    outs = []
    for t in range(T):
        xt = x[:, t, :]
        gi = jnp.dot(xt, w_ih.T, precision=hp) + b_ih
        gh = jnp.dot(h, w_hh.T, precision=hp) + b_hh
        i_r, i_z, i_n = gi[:, :H], gi[:, H:2 * H], gi[:, 2 * H:]
        h_r, h_z, h_n = gh[:, :H], gh[:, H:2 * H], gh[:, 2 * H:]
        r = jax.nn.sigmoid(i_r + h_r)
        z = jax.nn.sigmoid(i_z + h_z)
        n = jnp.tanh(i_n + r * h_n)
        h = (1.0 - z) * n + z * h
        outs.append(h)
    return jnp.stack(outs, axis=1), h[None]


if __name__ == "__main__":
    # Small shapes consistent with the module: vocab=16, embedding=32, hidden=32, batch=2, seq=8
    vocab_size, embedding_size, hidden_size = 16, 32, 32
    n_batch, seq_len = 2, 8

    key = jax.random.PRNGKey(0)
    k_tok, k_emb, k_wih, k_whh, k_bih, k_bhh = jax.random.split(key, 6)

    # Deterministic parameter init mimicking PyTorch defaults:
    #   nn.Embedding -> N(0, 1); nn.GRU -> U(-1/sqrt(H), 1/sqrt(H))
    bound = 1.0 / jnp.sqrt(hidden_size)
    emb_table = jax.random.normal(k_emb, (vocab_size, embedding_size), jnp.float32)
    w_ih = jax.random.uniform(k_wih, (3 * hidden_size, embedding_size), jnp.float32, -bound, bound)
    w_hh = jax.random.uniform(k_whh, (3 * hidden_size, hidden_size), jnp.float32, -bound, bound)
    b_ih = jax.random.uniform(k_bih, (3 * hidden_size,), jnp.float32, -bound, bound)
    b_hh = jax.random.uniform(k_bhh, (3 * hidden_size,), jnp.float32, -bound, bound)

    tokens = jax.random.randint(k_tok, (n_batch, seq_len), 0, vocab_size, jnp.int32)

    output, hidden = jax.jit(encoder_forward)(tokens, emb_table, w_ih, w_hh, b_ih, b_hh)
    output = jax.block_until_ready(output)
    hidden = jax.block_until_ready(hidden)

    # Sanity check against pure-JAX GRU reference
    ref_out, ref_hid = reference_forward(tokens, emb_table, w_ih, w_hh, b_ih, b_hh)
    assert output.shape == (n_batch, seq_len, hidden_size)
    assert hidden.shape == (1, n_batch, hidden_size)
    assert jnp.allclose(output, ref_out, atol=2e-5, rtol=2e-5)
    assert jnp.allclose(hidden, ref_hid, atol=2e-5, rtol=2e-5)

    print("KERNEL_OK")
</pallas_src>

<mosaic_0001>
module attributes {stable_mosaic.version = 11 : i64} {
  func.func @encoder_kernel(%arg0: memref<16x1xi32, #tpu.memory_space<vmem>>, %arg1: memref<16x32xf32, #tpu.memory_space<vmem>>, %arg2: memref<32x384xf32, #tpu.memory_space<vmem>>, %arg3: memref<1x384xf32, #tpu.memory_space<vmem>>, %arg4: memref<32x384xf32, #tpu.memory_space<vmem>>, %arg5: memref<1x32xf32, #tpu.memory_space<vmem>>, %arg6: memref<2x8x32xf32, #tpu.memory_space<vmem>>, %arg7: memref<2x32xf32, #tpu.memory_space<vmem>>) attributes {dimension_semantics = [], scalar_prefetch = 0 : i64, scratch_operands = 0 : i64, tpu.core_type = #tpu.core_type<tc>} {
    %0 = tpu.iota {dimensions = array<i32: 1>} : vector<16x16xi32>
    %c0 = arith.constant 0 : index
    %c0_0 = arith.constant 0 : index
    %1 = vector.load %arg0[%c0, %c0_0] : memref<16x1xi32, #tpu.memory_space<vmem>>, vector<16x1xi32>
    %2 = vector.broadcast %1 : vector<16x1xi32> to vector<16x16xi32>
    %3 = arith.cmpi eq, %2, %0 : vector<16x16xi32>
    %cst = arith.constant 1.000000e+00 : f32
    %cst_1 = arith.constant 0.000000e+00 : f32
    %4 = vector.broadcast %cst : f32 to vector<16x16xf32>
    %5 = vector.broadcast %cst_1 : f32 to vector<16x16xf32>
    %6 = arith.select %3, %4, %5 : vector<16x16xi1>, vector<16x16xf32>
    %c0_2 = arith.constant 0 : index
    %c0_3 = arith.constant 0 : index
    %7 = vector.load %arg1[%c0_2, %c0_3] : memref<16x32xf32, #tpu.memory_space<vmem>>, vector<16x32xf32>
    %cst_4 = arith.constant dense<0.000000e+00> : vector<16x32xf32>
    %8 = tpu.matmul %6, %7, %cst_4 {dimension_numbers = #tpu.dot_dimension_numbers<[1], [0], [0], [1], [0, 0, 1, 1], [], []>} : vector<16x16xf32>, vector<16x32xf32>, vector<16x32xf32> -> vector<16x32xf32>
    %c0_5 = arith.constant 0 : index
    %c0_6 = arith.constant 0 : index
    %9 = vector.load %arg2[%c0_5, %c0_6] : memref<32x384xf32, #tpu.memory_space<vmem>>, vector<32x384xf32>
    %cst_7 = arith.constant dense<0.000000e+00> : vector<16x384xf32>
    %10 = tpu.matmul %8, %9, %cst_7 {dimension_numbers = #tpu.dot_dimension_numbers<[1], [0], [0], [1], [0, 0, 1, 1], [], []>} : vector<16x32xf32>, vector<32x384xf32>, vector<16x384xf32> -> vector<16x384xf32>
    %c0_8 = arith.constant 0 : index
    %c0_9 = arith.constant 0 : index
    %11 = vector.load %arg3[%c0_8, %c0_9] : memref<1x384xf32, #tpu.memory_space<vmem>>, vector<1x384xf32>
    %12 = vector.broadcast %11 : vector<1x384xf32> to vector<16x384xf32>
    %13 = arith.addf %10, %12 : vector<16x384xf32>
    %c0_10 = arith.constant 0 : index
    %c0_11 = arith.constant 0 : index
    %14 = vector.load %arg4[%c0_10, %c0_11] : memref<32x384xf32, #tpu.memory_space<vmem>>, vector<32x384xf32>
    %c0_12 = arith.constant 0 : index
    %c0_13 = arith.constant 0 : index
    %15 = vector.load %arg5[%c0_12, %c0_13] : memref<1x32xf32, #tpu.memory_space<vmem>>, vector<1x32xf32>
    %16 = vector.shape_cast %15 : vector<1x32xf32> to vector<1x32xf32>
    %17 = vector.broadcast %16 : vector<1x32xf32> to vector<2x32xf32>
    %cst_14 = arith.constant 0.000000e+00 : f32
    %18 = vector.broadcast %cst_14 : f32 to vector<2x32xf32>
    %19 = vector.extract_strided_slice %13 {offsets = [0, 0], sizes = [2, 384], strides = [1, 1]} : vector<16x384xf32> to vector<2x384xf32>
    %cst_15 = arith.constant dense<0.000000e+00> : vector<2x384xf32>
    %20 = tpu.matmul %18, %14, %cst_15 {dimension_numbers = #tpu.dot_dimension_numbers<[1], [0], [0], [1], [0, 0, 1, 1], [], []>} : vector<2x32xf32>, vector<32x384xf32>, vector<2x384xf32> -> vector<2x384xf32>
    %21 = vector.extract_strided_slice %19 {offsets = [0, 0], sizes = [2, 32], strides = [1, 1]} : vector<2x384xf32> to vector<2x32xf32>
    %22 = vector.extract_strided_slice %20 {offsets = [0, 0], sizes = [2, 32], strides = [1, 1]} : vector<2x384xf32> to vector<2x32xf32>
    %23 = arith.addf %21, %22 : vector<2x32xf32>
    %24 = arith.negf %23 : vector<2x32xf32>
    %25 = math.exp %24 : vector<2x32xf32>
    %cst_16 = arith.constant 1.000000e+00 : f32
    %26 = vector.broadcast %cst_16 : f32 to vector<2x32xf32>
    %27 = arith.addf %26, %25 : vector<2x32xf32>
    %28 = arith.divf %26, %27 : vector<2x32xf32>
    %29 = vector.extract_strided_slice %19 {offsets = [0, 128], sizes = [2, 32], strides = [1, 1]} : vector<2x384xf32> to vector<2x32xf32>
    %30 = vector.extract_strided_slice %20 {offsets = [0, 128], sizes = [2, 32], strides = [1, 1]} : vector<2x384xf32> to vector<2x32xf32>
    %31 = arith.addf %29, %30 : vector<2x32xf32>
    %32 = arith.negf %31 : vector<2x32xf32>
    %33 = math.exp %32 : vector<2x32xf32>
    %cst_17 = arith.constant 1.000000e+00 : f32
    %34 = vector.broadcast %cst_17 : f32 to vector<2x32xf32>
    %35 = arith.addf %34, %33 : vector<2x32xf32>
    %36 = arith.divf %34, %35 : vector<2x32xf32>
    %37 = vector.extract_strided_slice %19 {offsets = [0, 256], sizes = [2, 32], strides = [1, 1]} : vector<2x384xf32> to vector<2x32xf32>
    %38 = vector.extract_strided_slice %20 {offsets = [0, 256], sizes = [2, 32], strides = [1, 1]} : vector<2x384xf32> to vector<2x32xf32>
    %39 = arith.addf %38, %17 : vector<2x32xf32>
    %40 = arith.mulf %28, %39 : vector<2x32xf32>
    %41 = arith.addf %37, %40 : vector<2x32xf32>
    %42 = math.tanh %41 : vector<2x32xf32>
    %43 = arith.subf %18, %42 : vector<2x32xf32>
    %44 = arith.mulf %36, %43 : vector<2x32xf32>
    %45 = arith.addf %42, %44 : vector<2x32xf32>
    %c0_18 = arith.constant 0 : index
    %c0_19 = arith.constant 0 : index
    %c0_20 = arith.constant 0 : index
    %46 = vector.load %arg6[%c0_18, %c0_19, %c0_20] : memref<2x8x32xf32, #tpu.memory_space<vmem>>, vector<2x1x32xf32>
    %47 = vector.shape_cast %46 : vector<2x1x32xf32> to vector<2x32xf32>
    %48 = vector.shape_cast %45 : vector<2x32xf32> to vector<2x1x32xf32>
    tpu.vector_store %arg6[%c0_18, %c0_19, %c0_20], %48 {strides = array<i32>} : memref<2x8x32xf32, #tpu.memory_space<vmem>>, vector<2x1x32xf32>,
    %49 = vector.extract_strided_slice %13 {offsets = [2, 0], sizes = [2, 384], strides = [1, 1]} : vector<16x384xf32> to vector<2x384xf32>
    %cst_21 = arith.constant dense<0.000000e+00> : vector<2x384xf32>
    %50 = tpu.matmul %45, %14, %cst_21 {dimension_numbers = #tpu.dot_dimension_numbers<[1], [0], [0], [1], [0, 0, 1, 1], [], []>} : vector<2x32xf32>, vector<32x384xf32>, vector<2x384xf32> -> vector<2x384xf32>
    %51 = vector.extract_strided_slice %49 {offsets = [0, 0], sizes = [2, 32], strides = [1, 1]} : vector<2x384xf32> to vector<2x32xf32>
    %52 = vector.extract_strided_slice %50 {offsets = [0, 0], sizes = [2, 32], strides = [1, 1]} : vector<2x384xf32> to vector<2x32xf32>
    %53 = arith.addf %51, %52 : vector<2x32xf32>
    %54 = arith.negf %53 : vector<2x32xf32>
    %55 = math.exp %54 : vector<2x32xf32>
    %cst_22 = arith.constant 1.000000e+00 : f32
    %56 = vector.broadcast %cst_22 : f32 to vector<2x32xf32>
    %57 = arith.addf %56, %55 : vector<2x32xf32>
    %58 = arith.divf %56, %57 : vector<2x32xf32>
    %59 = vector.extract_strided_slice %49 {offsets = [0, 128], sizes = [2, 32], strides = [1, 1]} : vector<2x384xf32> to vector<2x32xf32>
    %60 = vector.extract_strided_slice %50 {offsets = [0, 128], sizes = [2, 32], strides = [1, 1]} : vector<2x384xf32> to vector<2x32xf32>
    %61 = arith.addf %59, %60 : vector<2x32xf32>
    %62 = arith.negf %61 : vector<2x32xf32>
    %63 = math.exp %62 : vector<2x32xf32>
    %cst_23 = arith.constant 1.000000e+00 : f32
    %64 = vector.broadcast %cst_23 : f32 to vector<2x32xf32>
    %65 = arith.addf %64, %63 : vector<2x32xf32>
    %66 = arith.divf %64, %65 : vector<2x32xf32>
    %67 = vector.extract_strided_slice %49 {offsets = [0, 256], sizes = [2, 32], strides = [1, 1]} : vector<2x384xf32> to vector<2x32xf32>
    %68 = vector.extract_strided_slice %50 {offsets = [0, 256], sizes = [2, 32], strides = [1, 1]} : vector<2x384xf32> to vector<2x32xf32>
    %69 = arith.addf %68, %17 : vector<2x32xf32>
    %70 = arith.mulf %58, %69 : vector<2x32xf32>
    %71 = arith.addf %67, %70 : vector<2x32xf32>
    %72 = math.tanh %71 : vector<2x32xf32>
    %73 = arith.subf %45, %72 : vector<2x32xf32>
    %74 = arith.mulf %66, %73 : vector<2x32xf32>
    %75 = arith.addf %72, %74 : vector<2x32xf32>
    %c0_24 = arith.constant 0 : index
    %c1 = arith.constant 1 : index
    %c0_25 = arith.constant 0 : index
    %76 = vector.load %arg6[%c0_24, %c1, %c0_25] : memref<2x8x32xf32, #tpu.memory_space<vmem>>, vector<2x1x32xf32>
    %77 = vector.shape_cast %76 : vector<2x1x32xf32> to vector<2x32xf32>
    %78 = vector.shape_cast %75 : vector<2x32xf32> to vector<2x1x32xf32>
    tpu.vector_store %arg6[%c0_24, %c1, %c0_25], %78 {strides = array<i32>} : memref<2x8x32xf32, #tpu.memory_space<vmem>>, vector<2x1x32xf32>,
    %79 = vector.extract_strided_slice %13 {offsets = [4, 0], sizes = [2, 384], strides = [1, 1]} : vector<16x384xf32> to vector<2x384xf32>
    %cst_26 = arith.constant dense<0.000000e+00> : vector<2x384xf32>
    %80 = tpu.matmul %75, %14, %cst_26 {dimension_numbers = #tpu.dot_dimension_numbers<[1], [0], [0], [1], [0, 0, 1, 1], [], []>} : vector<2x32xf32>, vector<32x384xf32>, vector<2x384xf32> -> vector<2x384xf32>
    %81 = vector.extract_strided_slice %79 {offsets = [0, 0], sizes = [2, 32], strides = [1, 1]} : vector<2x384xf32> to vector<2x32xf32>
    %82 = vector.extract_strided_slice %80 {offsets = [0, 0], sizes = [2, 32], strides = [1, 1]} : vector<2x384xf32> to vector<2x32xf32>
    %83 = arith.addf %81, %82 : vector<2x32xf32>
    %84 = arith.negf %83 : vector<2x32xf32>
    %85 = math.exp %84 : vector<2x32xf32>
    %cst_27 = arith.constant 1.000000e+00 : f32
    %86 = vector.broadcast %cst_27 : f32 to vector<2x32xf32>
    %87 = arith.addf %86, %85 : vector<2x32xf32>
    %88 = arith.divf %86, %87 : vector<2x32xf32>
    %89 = vector.extract_strided_slice %79 {offsets = [0, 128], sizes = [2, 32], strides = [1, 1]} : vector<2x384xf32> to vector<2x32xf32>
    %90 = vector.extract_strided_slice %80 {offsets = [0, 128], sizes = [2, 32], strides = [1, 1]} : vector<2x384xf32> to vector<2x32xf32>
    %91 = arith.addf %89, %90 : vector<2x32xf32>
    %92 = arith.negf %91 : vector<2x32xf32>
    %93 = math.exp %92 : vector<2x32xf32>
    %cst_28 = arith.constant 1.000000e+00 : f32
    %94 = vector.broadcast %cst_28 : f32 to vector<2x32xf32>
    %95 = arith.addf %94, %93 : vector<2x32xf32>
    %96 = arith.divf %94, %95 : vector<2x32xf32>
    %97 = vector.extract_strided_slice %79 {offsets = [0, 256], sizes = [2, 32], strides = [1, 1]} : vector<2x384xf32> to vector<2x32xf32>
    %98 = vector.extract_strided_slice %80 {offsets = [0, 256], sizes = [2, 32], strides = [1, 1]} : vector<2x384xf32> to vector<2x32xf32>
    %99 = arith.addf %98, %17 : vector<2x32xf32>
    %100 = arith.mulf %88, %99 : vector<2x32xf32>
    %101 = arith.addf %97, %100 : vector<2x32xf32>
    %102 = math.tanh %101 : vector<2x32xf32>
    %103 = arith.subf %75, %102 : vector<2x32xf32>
    %104 = arith.mulf %96, %103 : vector<2x32xf32>
    %105 = arith.addf %102, %104 : vector<2x32xf32>
    %c0_29 = arith.constant 0 : index
    %c2 = arith.constant 2 : index
    %c0_30 = arith.constant 0 : index
    %106 = vector.load %arg6[%c0_29, %c2, %c0_30] : memref<2x8x32xf32, #tpu.memory_space<vmem>>, vector<2x1x32xf32>
    %107 = vector.shape_cast %106 : vector<2x1x32xf32> to vector<2x32xf32>
    %108 = vector.shape_cast %105 : vector<2x32xf32> to vector<2x1x32xf32>
    tpu.vector_store %arg6[%c0_29, %c2, %c0_30], %108 {strides = array<i32>} : memref<2x8x32xf32, #tpu.memory_space<vmem>>, vector<2x1x32xf32>,
    %109 = vector.extract_strided_slice %13 {offsets = [6, 0], sizes = [2, 384], strides = [1, 1]} : vector<16x384xf32> to vector<2x384xf32>
    %cst_31 = arith.constant dense<0.000000e+00> : vector<2x384xf32>
    %110 = tpu.matmul %105, %14, %cst_31 {dimension_numbers = #tpu.dot_dimension_numbers<[1], [0], [0], [1], [0, 0, 1, 1], [], []>} : vector<2x32xf32>, vector<32x384xf32>, vector<2x384xf32> -> vector<2x384xf32>
    %111 = vector.extract_strided_slice %109 {offsets = [0, 0], sizes = [2, 32], strides = [1, 1]} : vector<2x384xf32> to vector<2x32xf32>
    %112 = vector.extract_strided_slice %110 {offsets = [0, 0], sizes = [2, 32], strides = [1, 1]} : vector<2x384xf32> to vector<2x32xf32>
    %113 = arith.addf %111, %112 : vector<2x32xf32>
    %114 = arith.negf %113 : vector<2x32xf32>
    %115 = math.exp %114 : vector<2x32xf32>
    %cst_32 = arith.constant 1.000000e+00 : f32
    %116 = vector.broadcast %cst_32 : f32 to vector<2x32xf32>
    %117 = arith.addf %116, %115 : vector<2x32xf32>
    %118 = arith.divf %116, %117 : vector<2x32xf32>
    %119 = vector.extract_strided_slice %109 {offsets = [0, 128], sizes = [2, 32], strides = [1, 1]} : vector<2x384xf32> to vector<2x32xf32>
    %120 = vector.extract_strided_slice %110 {offsets = [0, 128], sizes = [2, 32], strides = [1, 1]} : vector<2x384xf32> to vector<2x32xf32>
    %121 = arith.addf %119, %120 : vector<2x32xf32>
    %122 = arith.negf %121 : vector<2x32xf32>
    %123 = math.exp %122 : vector<2x32xf32>
    %cst_33 = arith.constant 1.000000e+00 : f32
    %124 = vector.broadcast %cst_33 : f32 to vector<2x32xf32>
    %125 = arith.addf %124, %123 : vector<2x32xf32>
    %126 = arith.divf %124, %125 : vector<2x32xf32>
    %127 = vector.extract_strided_slice %109 {offsets = [0, 256], sizes = [2, 32], strides = [1, 1]} : vector<2x384xf32> to vector<2x32xf32>
    %128 = vector.extract_strided_slice %110 {offsets = [0, 256], sizes = [2, 32], strides = [1, 1]} : vector<2x384xf32> to vector<2x32xf32>
    %129 = arith.addf %128, %17 : vector<2x32xf32>
    %130 = arith.mulf %118, %129 : vector<2x32xf32>
    %131 = arith.addf %127, %130 : vector<2x32xf32>
    %132 = math.tanh %131 : vector<2x32xf32>
    %133 = arith.subf %105, %132 : vector<2x32xf32>
    %134 = arith.mulf %126, %133 : vector<2x32xf32>
    %135 = arith.addf %132, %134 : vector<2x32xf32>
    %c0_34 = arith.constant 0 : index
    %c3 = arith.constant 3 : index
    %c0_35 = arith.constant 0 : index
    %136 = vector.load %arg6[%c0_34, %c3, %c0_35] : memref<2x8x32xf32, #tpu.memory_space<vmem>>, vector<2x1x32xf32>
    %137 = vector.shape_cast %136 : vector<2x1x32xf32> to vector<2x32xf32>
    %138 = vector.shape_cast %135 : vector<2x32xf32> to vector<2x1x32xf32>
    tpu.vector_store %arg6[%c0_34, %c3, %c0_35], %138 {strides = array<i32>} : memref<2x8x32xf32, #tpu.memory_space<vmem>>, vector<2x1x32xf32>,
    %139 = vector.extract_strided_slice %13 {offsets = [8, 0], sizes = [2, 384], strides = [1, 1]} : vector<16x384xf32> to vector<2x384xf32>
    %cst_36 = arith.constant dense<0.000000e+00> : vector<2x384xf32>
    %140 = tpu.matmul %135, %14, %cst_36 {dimension_numbers = #tpu.dot_dimension_numbers<[1], [0], [0], [1], [0, 0, 1, 1], [], []>} : vector<2x32xf32>, vector<32x384xf32>, vector<2x384xf32> -> vector<2x384xf32>
    %141 = vector.extract_strided_slice %139 {offsets = [0, 0], sizes = [2, 32], strides = [1, 1]} : vector<2x384xf32> to vector<2x32xf32>
    %142 = vector.extract_strided_slice %140 {offsets = [0, 0], sizes = [2, 32], strides = [1, 1]} : vector<2x384xf32> to vector<2x32xf32>
    %143 = arith.addf %141, %142 : vector<2x32xf32>
    %144 = arith.negf %143 : vector<2x32xf32>
    %145 = math.exp %144 : vector<2x32xf32>
    %cst_37 = arith.constant 1.000000e+00 : f32
    %146 = vector.broadcast %cst_37 : f32 to vector<2x32xf32>
    %147 = arith.addf %146, %145 : vector<2x32xf32>
    %148 = arith.divf %146, %147 : vector<2x32xf32>
    %149 = vector.extract_strided_slice %139 {offsets = [0, 128], sizes = [2, 32], strides = [1, 1]} : vector<2x384xf32> to vector<2x32xf32>
    %150 = vector.extract_strided_slice %140 {offsets = [0, 128], sizes = [2, 32], strides = [1, 1]} : vector<2x384xf32> to vector<2x32xf32>
    %151 = arith.addf %149, %150 : vector<2x32xf32>
    %152 = arith.negf %151 : vector<2x32xf32>
    %153 = math.exp %152 : vector<2x32xf32>
    %cst_38 = arith.constant 1.000000e+00 : f32
    %154 = vector.broadcast %cst_38 : f32 to vector<2x32xf32>
    %155 = arith.addf %154, %153 : vector<2x32xf32>
    %156 = arith.divf %154, %155 : vector<2x32xf32>
    %157 = vector.extract_strided_slice %139 {offsets = [0, 256], sizes = [2, 32], strides = [1, 1]} : vector<2x384xf32> to vector<2x32xf32>
    %158 = vector.extract_strided_slice %140 {offsets = [0, 256], sizes = [2, 32], strides = [1, 1]} : vector<2x384xf32> to vector<2x32xf32>
    %159 = arith.addf %158, %17 : vector<2x32xf32>
    %160 = arith.mulf %148, %159 : vector<2x32xf32>
    %161 = arith.addf %157, %160 : vector<2x32xf32>
    %162 = math.tanh %161 : vector<2x32xf32>
    %163 = arith.subf %135, %162 : vector<2x32xf32>
    %164 = arith.mulf %156, %163 : vector<2x32xf32>
    %165 = arith.addf %162, %164 : vector<2x32xf32>
    %c0_39 = arith.constant 0 : index
    %c4 = arith.constant 4 : index
    %c0_40 = arith.constant 0 : index
    %166 = vector.load %arg6[%c0_39, %c4, %c0_40] : memref<2x8x32xf32, #tpu.memory_space<vmem>>, vector<2x1x32xf32>
    %167 = vector.shape_cast %166 : vector<2x1x32xf32> to vector<2x32xf32>
    %168 = vector.shape_cast %165 : vector<2x32xf32> to vector<2x1x32xf32>
    tpu.vector_store %arg6[%c0_39, %c4, %c0_40], %168 {strides = array<i32>} : memref<2x8x32xf32, #tpu.memory_space<vmem>>, vector<2x1x32xf32>,
    %169 = vector.extract_strided_slice %13 {offsets = [10, 0], sizes = [2, 384], strides = [1, 1]} : vector<16x384xf32> to vector<2x384xf32>
    %cst_41 = arith.constant dense<0.000000e+00> : vector<2x384xf32>
    %170 = tpu.matmul %165, %14, %cst_41 {dimension_numbers = #tpu.dot_dimension_numbers<[1], [0], [0], [1], [0, 0, 1, 1], [], []>} : vector<2x32xf32>, vector<32x384xf32>, vector<2x384xf32> -> vector<2x384xf32>
    %171 = vector.extract_strided_slice %169 {offsets = [0, 0], sizes = [2, 32], strides = [1, 1]} : vector<2x384xf32> to vector<2x32xf32>
    %172 = vector.extract_strided_slice %170 {offsets = [0, 0], sizes = [2, 32], strides = [1, 1]} : vector<2x384xf32> to vector<2x32xf32>
    %173 = arith.addf %171, %172 : vector<2x32xf32>
    %174 = arith.negf %173 : vector<2x32xf32>
    %175 = math.exp %174 : vector<2x32xf32>
    %cst_42 = arith.constant 1.000000e+00 : f32
    %176 = vector.broadcast %cst_42 : f32 to vector<2x32xf32>
    %177 = arith.addf %176, %175 : vector<2x32xf32>
    %178 = arith.divf %176, %177 : vector<2x32xf32>
    %179 = vector.extract_strided_slice %169 {offsets = [0, 128], sizes = [2, 32], strides = [1, 1]} : vector<2x384xf32> to vector<2x32xf32>
    %180 = vector.extract_strided_slice %170 {offsets = [0, 128], sizes = [2, 32], strides = [1, 1]} : vector<2x384xf32> to vector<2x32xf32>
    %181 = arith.addf %179, %180 : vector<2x32xf32>
    %182 = arith.negf %181 : vector<2x32xf32>
    %183 = math.exp %182 : vector<2x32xf32>
    %cst_43 = arith.constant 1.000000e+00 : f32
    %184 = vector.broadcast %cst_43 : f32 to vector<2x32xf32>
    %185 = arith.addf %184, %183 : vector<2x32xf32>
    %186 = arith.divf %184, %185 : vector<2x32xf32>
    %187 = vector.extract_strided_slice %169 {offsets = [0, 256], sizes = [2, 32], strides = [1, 1]} : vector<2x384xf32> to vector<2x32xf32>
    %188 = vector.extract_strided_slice %170 {offsets = [0, 256], sizes = [2, 32], strides = [1, 1]} : vector<2x384xf32> to vector<2x32xf32>
    %189 = arith.addf %188, %17 : vector<2x32xf32>
    %190 = arith.mulf %178, %189 : vector<2x32xf32>
    %191 = arith.addf %187, %190 : vector<2x32xf32>
    %192 = math.tanh %191 : vector<2x32xf32>
    %193 = arith.subf %165, %192 : vector<2x32xf32>
    %194 = arith.mulf %186, %193 : vector<2x32xf32>
    %195 = arith.addf %192, %194 : vector<2x32xf32>
    %c0_44 = arith.constant 0 : index
    %c5 = arith.constant 5 : index
    %c0_45 = arith.constant 0 : index
    %196 = vector.load %arg6[%c0_44, %c5, %c0_45] : memref<2x8x32xf32, #tpu.memory_space<vmem>>, vector<2x1x32xf32>
    %197 = vector.shape_cast %196 : vector<2x1x32xf32> to vector<2x32xf32>
    %198 = vector.shape_cast %195 : vector<2x32xf32> to vector<2x1x32xf32>
    tpu.vector_store %arg6[%c0_44, %c5, %c0_45], %198 {strides = array<i32>} : memref<2x8x32xf32, #tpu.memory_space<vmem>>, vector<2x1x32xf32>,
    %199 = vector.extract_strided_slice %13 {offsets = [12, 0], sizes = [2, 384], strides = [1, 1]} : vector<16x384xf32> to vector<2x384xf32>
    %cst_46 = arith.constant dense<0.000000e+00> : vector<2x384xf32>
    %200 = tpu.matmul %195, %14, %cst_46 {dimension_numbers = #tpu.dot_dimension_numbers<[1], [0], [0], [1], [0, 0, 1, 1], [], []>} : vector<2x32xf32>, vector<32x384xf32>, vector<2x384xf32> -> vector<2x384xf32>
    %201 = vector.extract_strided_slice %199 {offsets = [0, 0], sizes = [2, 32], strides = [1, 1]} : vector<2x384xf32> to vector<2x32xf32>
    %202 = vector.extract_strided_slice %200 {offsets = [0, 0], sizes = [2, 32], strides = [1, 1]} : vector<2x384xf32> to vector<2x32xf32>
    %203 = arith.addf %201, %202 : vector<2x32xf32>
    %204 = arith.negf %203 : vector<2x32xf32>
    %205 = math.exp %204 : vector<2x32xf32>
    %cst_47 = arith.constant 1.000000e+00 : f32
    %206 = vector.broadcast %cst_47 : f32 to vector<2x32xf32>
    %207 = arith.addf %206, %205 : vector<2x32xf32>
    %208 = arith.divf %206, %207 : vector<2x32xf32>
    %209 = vector.extract_strided_slice %199 {offsets = [0, 128], sizes = [2, 32], strides = [1, 1]} : vector<2x384xf32> to vector<2x32xf32>
    %210 = vector.extract_strided_slice %200 {offsets = [0, 128], sizes = [2, 32], strides = [1, 1]} : vector<2x384xf32> to vector<2x32xf32>
    %211 = arith.addf %209, %210 : vector<2x32xf32>
    %212 = arith.negf %211 : vector<2x32xf32>
    %213 = math.exp %212 : vector<2x32xf32>
    %cst_48 = arith.constant 1.000000e+00 : f32
    %214 = vector.broadcast %cst_48 : f32 to vector<2x32xf32>
    %215 = arith.addf %214, %213 : vector<2x32xf32>
    %216 = arith.divf %214, %215 : vector<2x32xf32>
    %217 = vector.extract_strided_slice %199 {offsets = [0, 256], sizes = [2, 32], strides = [1, 1]} : vector<2x384xf32> to vector<2x32xf32>
    %218 = vector.extract_strided_slice %200 {offsets = [0, 256], sizes = [2, 32], strides = [1, 1]} : vector<2x384xf32> to vector<2x32xf32>
    %219 = arith.addf %218, %17 : vector<2x32xf32>
    %220 = arith.mulf %208, %219 : vector<2x32xf32>
    %221 = arith.addf %217, %220 : vector<2x32xf32>
    %222 = math.tanh %221 : vector<2x32xf32>
    %223 = arith.subf %195, %222 : vector<2x32xf32>
    %224 = arith.mulf %216, %223 : vector<2x32xf32>
    %225 = arith.addf %222, %224 : vector<2x32xf32>
    %c0_49 = arith.constant 0 : index
    %c6 = arith.constant 6 : index
    %c0_50 = arith.constant 0 : index
    %226 = vector.load %arg6[%c0_49, %c6, %c0_50] : memref<2x8x32xf32, #tpu.memory_space<vmem>>, vector<2x1x32xf32>
    %227 = vector.shape_cast %226 : vector<2x1x32xf32> to vector<2x32xf32>
    %228 = vector.shape_cast %225 : vector<2x32xf32> to vector<2x1x32xf32>
    tpu.vector_store %arg6[%c0_49, %c6, %c0_50], %228 {strides = array<i32>} : memref<2x8x32xf32, #tpu.memory_space<vmem>>, vector<2x1x32xf32>,
    %229 = vector.extract_strided_slice %13 {offsets = [14, 0], sizes = [2, 384], strides = [1, 1]} : vector<16x384xf32> to vector<2x384xf32>
    %cst_51 = arith.constant dense<0.000000e+00> : vector<2x384xf32>
    %230 = tpu.matmul %225, %14, %cst_51 {dimension_numbers = #tpu.dot_dimension_numbers<[1], [0], [0], [1], [0, 0, 1, 1], [], []>} : vector<2x32xf32>, vector<32x384xf32>, vector<2x384xf32> -> vector<2x384xf32>
    %231 = vector.extract_strided_slice %229 {offsets = [0, 0], sizes = [2, 32], strides = [1, 1]} : vector<2x384xf32> to vector<2x32xf32>
    %232 = vector.extract_strided_slice %230 {offsets = [0, 0], sizes = [2, 32], strides = [1, 1]} : vector<2x384xf32> to vector<2x32xf32>
    %233 = arith.addf %231, %232 : vector<2x32xf32>
    %234 = arith.negf %233 : vector<2x32xf32>
    %235 = math.exp %234 : vector<2x32xf32>
    %cst_52 = arith.constant 1.000000e+00 : f32
    %236 = vector.broadcast %cst_52 : f32 to vector<2x32xf32>
    %237 = arith.addf %236, %235 : vector<2x32xf32>
    %238 = arith.divf %236, %237 : vector<2x32xf32>
    %239 = vector.extract_strided_slice %229 {offsets = [0, 128], sizes = [2, 32], strides = [1, 1]} : vector<2x384xf32> to vector<2x32xf32>
    %240 = vector.extract_strided_slice %230 {offsets = [0, 128], sizes = [2, 32], strides = [1, 1]} : vector<2x384xf32> to vector<2x32xf32>
    %241 = arith.addf %239, %240 : vector<2x32xf32>
    %242 = arith.negf %241 : vector<2x32xf32>
    %243 = math.exp %242 : vector<2x32xf32>
    %cst_53 = arith.constant 1.000000e+00 : f32
    %244 = vector.broadcast %cst_53 : f32 to vector<2x32xf32>
    %245 = arith.addf %244, %243 : vector<2x32xf32>
    %246 = arith.divf %244, %245 : vector<2x32xf32>
    %247 = vector.extract_strided_slice %229 {offsets = [0, 256], sizes = [2, 32], strides = [1, 1]} : vector<2x384xf32> to vector<2x32xf32>
    %248 = vector.extract_strided_slice %230 {offsets = [0, 256], sizes = [2, 32], strides = [1, 1]} : vector<2x384xf32> to vector<2x32xf32>
    %249 = arith.addf %248, %17 : vector<2x32xf32>
    %250 = arith.mulf %238, %249 : vector<2x32xf32>
    %251 = arith.addf %247, %250 : vector<2x32xf32>
    %252 = math.tanh %251 : vector<2x32xf32>
    %253 = arith.subf %225, %252 : vector<2x32xf32>
    %254 = arith.mulf %246, %253 : vector<2x32xf32>
    %255 = arith.addf %252, %254 : vector<2x32xf32>
    %c0_54 = arith.constant 0 : index
    %c7 = arith.constant 7 : index
    %c0_55 = arith.constant 0 : index
    %256 = vector.load %arg6[%c0_54, %c7, %c0_55] : memref<2x8x32xf32, #tpu.memory_space<vmem>>, vector<2x1x32xf32>
    %257 = vector.shape_cast %256 : vector<2x1x32xf32> to vector<2x32xf32>
    %258 = vector.shape_cast %255 : vector<2x32xf32> to vector<2x1x32xf32>
    tpu.vector_store %arg6[%c0_54, %c7, %c0_55], %258 {strides = array<i32>} : memref<2x8x32xf32, #tpu.memory_space<vmem>>, vector<2x1x32xf32>,
    %c0_56 = arith.constant 0 : index
    %c0_57 = arith.constant 0 : index
    %259 = vector.load %arg7[%c0_56, %c0_57] : memref<2x32xf32, #tpu.memory_space<vmem>>, vector<2x32xf32>
    tpu.vector_store %arg7[%c0_56, %c0_57], %255 {strides = array<i32>} : memref<2x32xf32, #tpu.memory_space<vmem>>, vector<2x32xf32>,
    return
  }
}

</mosaic_0001>

<bundles_post_ra>
// kernel: encoder_forward.1
= control target key start
LH: loop header
LB: loop body
LE: loop exit
PB: predicated region body
PF: predicated region fallthrough
CT: control target
= control target key end

     0   :  { %13 = vsyncpa [#allocation3], 0  ;;  %v2470_v1 = vmov 0   ;;  %s2847_s0 = inlined_call_operand.vmem [shape: s32[16,1], index: 0, kind: input, shape index: {}]   ;;  %s2848_s1 = inlined_call_operand.vmem [shape: f32[16,32], index: 1, kind: input, shape index: {}]   ;;  %s2849_s2 = inlined_call_operand.vmem [shape: f32[32,384], index: 2, kind: input, shape index: {}]   ;;  %s2850_s3 = inlined_call_operand.vmem [shape: f32[1,384], index: 3, kind: input, shape index: {}]   ;;  %s2851_s4 = inlined_call_operand.vmem [shape: f32[32,384], index: 4, kind: input, shape index: {}]   ;;  %s2852_s5 = inlined_call_operand.vmem [shape: f32[1,32], index: 5, kind: input, shape index: {}]   ;;  %s2853_s6 = inlined_call_operand.hbm [shape: f32[2,8,32], index: 6, kind: output, shape index: {0}]   ;;  %s2854_s7 = inlined_call_operand.hbm [shape: f32[2,32], index: 7, kind: output, shape index: {1}]  }
   0x1   :  { %v29_v0 = vld [vmem:[%s2847_s0] sm:$0xff]  ;;  %2341 = vset.pattern.permute.xlu0 %v2470_v1  ;;  %v42_v3 = vld [vmem:[%s2848_s1 + $0x8] sm:$0xff] }
   0x2   :  { %v41_v2 = vld [vmem:[%s2848_s1] sm:$0xff] }
   0x3   :  { %14 = vsyncpa [#allocation5], 0  ;;  %32 = vperm.xlu0 %2341, %v29_v0   ;;  %v2200_v4 = vpack.c.bf16 %v42_v3, %v41_v2  ;;  %v30_v5 = vld [vmem:[%s2847_s0 + $0x8] sm:$0xff]  ;;  %v2471_v6 = vmov 0.0   ;;  %v129_v8 = vld [vmem:[%s2849_s2 + $0x20] sm:$0xff]  ;;  %v27_v22 = vlaneseq  ;;  %vm43_vm0 = vcmask 130048  }
   0x4   :  { %225 = vmatprep.mubr.f32.mxu1 %v2471_v6  ;;  %v126_v7 = vld [vmem:[%s2849_s2 + $0x8] sm:$0xff]  ;;  %v125_v9 = vld [vmem:[%s2849_s2] sm:$0xff]  ;;  %v128_v11 = vld [vmem:[%s2849_s2 + $0x18] sm:$0xff]  ;;  %v2472_v34 = vmov 0.0|0.0   ;;  %vm154_vm3 = vcmask 261120   ;;  %vm2473_vm4 = vmmov 0  }
   0x5   :  { %2201 = vmatprep.subr.bf16.mxu0 %v2200_v4  ;;  %v2204_v10 = vpack.c.bf16 %v129_v8, %v126_v7  ;;  %v127_v12 = vld [vmem:[%s2849_s2 + $0x10] sm:$0xff]  ;;  %v130_v13 = vld [vmem:[%s2849_s2 + $0x28] sm:$0xff]  ;;  %v2206_v14 = vpack.c.bf16 %v128_v11, %v125_v9  ;;  %v132_v16 = vld [vmem:[%s2849_s2 + $0x38] sm:$0xff]  ;;  %v28_v23 = vand.u32 127, %v27_v22  ;;  %v140_v52 = vshrl.u32 %v27_v22, 7 }
   0x6   :  { %2203 = vmatpush3.bf16.msra.mxu0 %v2200_v4  ;;  %v2212_v15 = vpack.c.bf16 %v130_v13, %v127_v12  ;;  %v135_v17 = vld [vmem:[%s2849_s2 + $0x50] sm:$0xff]  ;;  %v134_v20 = vld [vmem:[%s2849_s2 + $0x48] sm:$0xff]  ;;  %v133_v26 = vld [vmem:[%s2849_s2 + $0x40] sm:$0xff]  ;;  %vm522_vm5 = vcmask 253952   ;;  %vm1975_vm6 = vcmask 261126  }
   0x7   :  { %35 = vperm.xlu0 %2341, %v30_v5   ;;  %v131_v18 = vld [vmem:[%s2849_s2 + $0x30] sm:$0xff]  ;;  %2205 = vmatprep.subr.bf16.mxu1 %v2204_v10  ;;  %v2208_v19 = vpack.c.bf16 %v135_v17, %v132_v16  ;;  %v136_v27 = vld [vmem:[%s2849_s2 + $0x58] sm:$0xff]  ;;  %v314_v31 = vld [vmem:[%s2851_s4 + $0x8] sm:$0xff]  ;;  %v141_v53 = vsub.s32 0, %v140_v52  ;;  %v145_v55 = vsub.s32 1, %v140_v52  ;;  %v149_v56 = vsub.s32 2, %v140_v52 }
   0x8   :  { %2207 = vmatpush1.bf16.msra.mxu1 %v2206_v14  ;;  %2213 = vmatprep.subr.bf16.mxu0 %v2212_v15  ;;  %v2210_v21 = vpack.c.bf16 %v134_v20, %v131_v18  ;;  %v2216_v29 = vpack.c.bf16 %v136_v27, %v133_v26  ;;  %v317_v32 = vld [vmem:[%s2851_s4 + $0x20] sm:$0xff]  ;;  %v316_v36 = vld [vmem:[%s2851_s4 + $0x18] sm:$0xff]  ;;  %v323_v38 = vld [vmem:[%s2851_s4 + $0x50] sm:$0xff]  ;;  %v2474_v26 = vmov 1966171168  }
   0x9   :  { %2209 = vmatprep.subr.bf16.mxu1 %v2208_v19  ;;  %v2577_v33 = vpack.c.bf16 %v317_v32, %v314_v31  ;;  %v313_v35 = vld [vmem:[%s2851_s4] sm:$0xff]  ;;  %v320_v37 = vld [vmem:[%s2851_s4 + $0x38] sm:$0xff]  ;;  %v315_v39 = vld [vmem:[%s2851_s4 + $0x10] sm:$0xff]  ;;  %v499_v27 = vunpack.c.l.s4 %v2474_v26 }
   0xa   :  { %v318_v40 = vld [vmem:[%s2851_s4 + $0x28] sm:$0xff]  ;;  %v2599_v41 = vpack.c.bf16 %v316_v36, %v313_v35  ;;  %v2601_v43 = vpack.c.bf16 %v323_v38, %v320_v37  ;;  %v319_v44 = vld [vmem:[%s2851_s4 + $0x30] sm:$0xff]  ;;  %v321_v48 = vld [vmem:[%s2851_s4 + $0x40] sm:$0xff] }
   0xb   :  { %v322_v45 = vld [vmem:[%s2851_s4 + $0x48] sm:$0xff]  ;;  %v2609_v47 = vpack.c.bf16 %v318_v40, %v315_v39  ;;  %v324_v49 = vld [vmem:[%s2851_s4 + $0x58] sm:$0xff]  ;;  %v137_v54 = vld [vmem:[%s2850_s3] sm:$0x7] }
   0xc   :  { %2211 = vmatpush1.bf16.msra.mxu1 %v2210_v21  ;;  %v2621_v50 = vpack.c.bf16 %v322_v45, %v319_v44  ;;  %v2626_v51 = vpack.c.bf16 %v324_v49, %v321_v48  ;;  %v142_v57 = vrot.slane %v137_v54, %v141_v53  ;;  %v146_v58 = vrot.slane %v137_v54, %v145_v55  ;;  %v2671_v19 = vld [vmem:[%s2852_s5] ss:$0 sm:$0xff]  ;;  %s2475_s5 = smov [#allocation4]  }
   0xd   :  { %2221 = vmatprep.subr.bf16.mxu1 %v2577_v33  ;;  %v150_v59 = vrot.slane %v137_v54, %v149_v56  ;;  %s1995_s8 = sshll.u32 %s2475_s5, 4  ;;  %s1996_s8 = int_to_ptr.vmem [resolvable:$true] %s1995_s8 }
   0xe   :  { %s2422_s9 = scalar_lea.vmem %s1996_s8, 32  ;;  %p2427_p1 = scmp.lt.s32.totalorder %s1996_s8, %s1996_s8 }
   0xf   :  { %p2423_p0 = scmp.ne.s32.totalorder %s1996_s8, %s2422_s9  ;;  %p2428_p2 = scmp.lt.s32.totalorder %s2422_s9, %s2422_s9 }
  0x11   :  { %p2429_p3 = por %p2428_p2, %p2427_p1 }
  0x13   :  { %p2430_p4 = pnand %p2429_p3, %p2423_p0 }
  0x82   :  { %v33_v24 = vpop.permute.xlu0 %32 }
  0x83   :  { %vm37_vm1 = vcmp.eq.s32.totalorder %v33_v24, %v28_v23 }
  0x84   :  { %v39_v25 = vsel %vm37_vm1, 1.0, %v2471_v6 }
  0x85   :  { %2098 = vmatprep.mubr.msk.f32.mxu0 %vm43_vm0, %v39_v25 }
  0x86   :  { %v36_v28 = vpop.permute.xlu0 %35 }
  0x87   :  { %vm38_vm2 = vcmp.eq.s32.totalorder %v36_v28, %v28_v23  ;;  %v500_v28 = vunpack.c.0.s8 %v499_v27 }
  0x88   :  { %v40_v30 = vsel %vm38_vm2, 1.0, %v2471_v6 }
  0x89   :  { %2099 = vmatmul.mubr.msk.f32.vlgmr.msra.gmra.mrb[0].mxu0 %vm43_vm0, %v40_v30  ;;  %v2675_v32 = vsub.s32 %v500_v28, %v140_v52 }
  0x8a   :  { %2215 = vmatpush3.bf16.msra.mxu0 %v2212_v15 }
  0x8b   :  { %2217 = vmatprep.subr.bf16.mxu0 %v2216_v29 }
  0x8e   :  { %2219 = vmatpush3.bf16.msra.mxu0 %v2216_v29 }
  0x8f   :  { %2228 = vmatprep.subr.bf16.mxu0 %v2472_v34 }
 0x15c   :  { %v2100_v42 = vpop.f32.mrb[0].mxu0 }
 0x15d   :  { %v116_v46 = vpop.f32.mrb[1].mxu0 }
 0x15e   :  { %2009 = vmatmul.mubr.msk.f32.vlgmr.msra.gmra.mrb[0].mxu1 %vm154_vm3, %v116_v46  ;;  %2109 = vmatprep.mubr.msk.f32.mxu0 %vm154_vm3, %v116_v46 }
 0x15f   :  { %2223 = vmatpush1.bf16.msra.mxu1 %v2599_v41  ;;  %2110 = vmatmul.mubr.msk.f32.vlgmr.msra.gmra.mrb[2].mxu0 %vm154_vm3, %v2100_v42 }
 0x160   :  { %231 = vmatprep.mubr.f32.mxu1 %v2471_v6  ;;  %2225 = vmatprep.subr.bf16.mxu1 %v2601_v43 }
 0x161   :  { %2230 = vmatpush3.bf16.msra.mxu0 %v2609_v47  ;;  %2120 = vmatprep.mubr.msk.f32.mxu0 %vm2473_vm4, %v2471_v6 }
 0x162   :  { %2010 = vmatmul.mubr.msk.f32.gmra.mrb[2].mxu1 %vm154_vm3, %v2100_v42  ;;  %2231 = vmatprep.subr.bf16.mxu0 %v2472_v34 }
 0x163   :  { %2227 = vmatpush1.bf16.msra.mxu1 %v2621_v50  ;;  %399 = vmatprep.mubr.f32.mxu1 %v2471_v6 }
 0x164   :  { %2235 = vmatprep.subr.bf16.mxu1 %v2577_v33 }
 0x165   :  { %2233 = vmatpush3.bf16.msra.mxu0 %v2626_v51 }
 0x166   :  { %400 = vmatmul.mubr.f32.vlgmr.msra.gmra.mrb[4].mxu1 %v2471_v6  ;;  %2242 = vmatprep.subr.bf16.mxu0 %v2472_v34 }
 0x167   :  { %2237 = vmatpush1.bf16.msra.mxu1 %v2599_v41  ;;  %591 = vmatprep.mubr.f32.mxu1 %v2471_v6 }
 0x168   :  { %2121 = vmatmul.mubr.f32.vlgmr.msra.gmra.mrb[4].mxu0 %v2471_v6  ;;  %2239 = vmatprep.subr.bf16.mxu1 %v2601_v43 }
 0x169   :  { %2244 = vmatpush3.bf16.msra.mxu0 %v2609_v47  ;;  %2131 = vmatprep.mubr.msk.f32.mxu0 %vm2473_vm4, %v2471_v6 }
 0x16a   :  { %2245 = vmatprep.subr.bf16.mxu0 %v2472_v34 }
 0x16b   :  { %2241 = vmatpush1.bf16.msra.mxu1 %v2621_v50 }
 0x16c   :  { %2249 = vmatprep.subr.bf16.mxu1 %v2577_v33 }
 0x16d   :  { %2247 = vmatpush3.bf16.msra.mxu0 %v2626_v51 }
 0x16e   :  { %2256 = vmatprep.subr.bf16.mxu0 %v2472_v34 }
 0x231   :  { %v227_v60 = vpop.f32.mrb[0].mxu1 }
 0x232   :  { %v2654_v61 = vadd.f32 %v227_v60, %v142_v57  ;;  %v229_v62 = vpop.f32.mrb[1].mxu1  ;;  %v2111_v63 = vpop.f32.mrb[2].mxu0 }
 0x233   :  { %v2656_v0 = vadd.f32 %v229_v62, %v146_v58  ;;  %v2658_v1 = vadd.f32 %v2111_v63, %v150_v59  ;;  %v304_v2 = vpop.f32.mrb[3].mxu0 }
 0x234   :  { %v2660_v3 = vadd.f32 %v304_v2, %v150_v59 }
 0x235   :  { %v233_v4 = vpop.f32.mrb[2].mxu1 }
 0x236   :  { %v2662_v5 = vadd.f32 %v233_v4, %v142_v57  ;;  %v235_v7 = vpop.f32.mrb[3].mxu1 }
 0x237   :  { %v2664_v8 = vadd.f32 %v235_v7, %v146_v58 }
 0x239   :  { %v401_v9 = vpop.f32.mrb[4].mxu1 }
 0x23a   :  { %v476_v10 = vadd.f32 %v401_v9, %v2654_v61  ;;  %v403_v11 = vpop.f32.mrb[5].mxu1 }
 0x23b   :  { %v472_v12 = vpop.f32.mrb[4].mxu0  ;;  %v483_v15 = vadd.f32 %v403_v11, %v2656_v0 }
 0x23c   :  { %v2014_v13 = vmul.f32 -1.442695, %v476_v10  ;;  %v2122_v14 = vpop.f32.mrb[5].mxu0  ;;  %v490_v20 = vadd.f32 %v2671_v19, %v472_v12 }
 0x23d   :  { %v2015_v16 = vmul.f32 -1.442695, %v483_v15 }
 0x23e   :  { %2342 = vpow2.f32 %v2014_v13 }
 0x23f   :  { %2344 = vpow2.f32 %v2015_v16 }
 0x248   :  { %v2343_v17 = vpop.eup %2342 }
 0x249   :  { %v480_v18 = vadd.f32 1.0, %v2343_v17  ;;  %v2345_v21 = vpop.eup %2344 }
 0x24a   :  { %v487_v24 = vadd.f32 1.0, %v2345_v21 }
 0x24b   :  { %2346 = vrcp.f32 %v480_v18 }
 0x255   :  { %v2347_v22 = vpop.eup %2346 }
 0x256   :  { %v491_v23 = vmul.f32 %v2347_v22, %v490_v20 }
 0x258   :  { %v492_v25 = vadd.f32 %v491_v23, %v2660_v3 }
 0x25a   :  { %2348 = vtanh.f32 %v492_v25 }
 0x25b   :  { %2350 = vrcp.f32 %v487_v24 }
 0x264   :  { %v2349_v29 = vpop.eup %2348 }
 0x265   :  { %v494_v30 = vsub.f32 0.0, %v2349_v29  ;;  %v2351_v31 = vpop.eup %2350 }
 0x267   :  { %v495_v35 = vmul.f32 %v2351_v31, %v494_v30 }
 0x269   :  { %v496_v36 = vadd.f32 %v2349_v29, %v495_v35 }
 0x26b   :  { %v504_v37 = vrot.slane %v496_v36, %v2675_v32  ;;  %2016 = vmatmul.mubr.msk.f32.vlgmr.msra.gmra.mrb[6].mxu1 %vm154_vm3, %v496_v36  ;;  %2132 = vmatmul.mubr.msk.f32.vlgmr.msra.gmra.mrb[6].mxu0 %vm154_vm3, %v496_v36 }
 0x26c   :  { %2251 = vmatpush1.bf16.msra.mxu1 %v2599_v41  ;;  %2258 = vmatpush3.bf16.msra.mxu0 %v2609_v47 }
 0x26d   :  { %v505_v38 = vcombine.high %v504_v37, %v504_v37  ;;  %v512_v39 = vrot.slane %v504_v37, %v2675_v32  ;;  %2253 = vmatprep.subr.bf16.mxu1 %v2601_v43  ;;  %2259 = vmatprep.subr.bf16.mxu0 %v2472_v34 }
 0x26e   :  { %800 = vmatprep.mubr.f32.mxu1 %v2471_v6  ;;  %2142 = vmatprep.mubr.msk.f32.mxu0 %vm2473_vm4, %v2471_v6 }
 0x26f   :  { %v519_v40 = vrot.slane %v505_v38, %v2675_v32  ;;  %523 = vst.msk [vmem:[#allocation2] sm:$0x1] %vm522_vm5, %v512_v39 }
 0x270   :  { %2255 = vmatpush1.bf16.msra.mxu1 %v2621_v50  ;;  %2261 = vmatpush3.bf16.msra.mxu0 %v2626_v51 }
 0x271   :  { %524 = vst.msk [vmem:[#allocation2 + $0x8] sm:$0x1] %vm522_vm5, %v519_v40  ;;  %2263 = vmatprep.subr.bf16.mxu1 %v2577_v33  ;;  %2270 = vmatprep.subr.bf16.mxu0 %v2472_v34 }
 0x33e   :  { %v593_v42 = vpop.f32.mrb[6].mxu1  ;;  %v664_v44 = vpop.f32.mrb[6].mxu0 }
 0x33f   :  { %v669_v45 = vrot.slane %v593_v42, 6  ;;  %v595_v46 = vpop.f32.mrb[7].mxu1  ;;  %v2133_v48 = vpop.f32.mrb[7].mxu0  ;;  %v688_v58 = vadd.f32 %v2671_v19, %v664_v44 }
 0x340   :  { %v679_v53 = vrot.slane %v595_v46, 6 }
 0x341   :  { %v671_v49 = vadd.f32 %v669_v45, %v2654_v61  ;;  %v690_v59 = vrot.slane %v688_v58, 6 }
 0x342   :  { %v681_v54 = vadd.f32 %v679_v53, %v2656_v0 }
 0x343   :  { %v2018_v52 = vmul.f32 -1.442695, %v671_v49 }
 0x344   :  { %v2019_v57 = vmul.f32 -1.442695, %v681_v54 }
 0x345   :  { %2352 = vpow2.f32 %v2018_v52 }
 0x34f   :  { %v2353_v55 = vpop.eup %2352 }
 0x350   :  { %v675_v56 = vadd.f32 1.0, %v2353_v55 }
 0x352   :  { %2354 = vrcp.f32 %v675_v56 }
 0x353   :  { %2356 = vpow2.f32 %v2019_v57 }
 0x35c   :  { %v2355_v60 = vpop.eup %2354 }
 0x35d   :  { %v692_v62 = vmul.f32 %v2355_v60, %v690_v59  ;;  %v2357_v2 = vpop.eup %2356 }
 0x35e   :  { %v685_v4 = vadd.f32 1.0, %v2357_v2 }
 0x35f   :  { %v693_v63 = vadd.f32 %v692_v62, %v2660_v3 }
 0x361   :  { %2358 = vtanh.f32 %v693_v63 }
 0x362   :  { %2360 = vrcp.f32 %v685_v4 }
 0x36b   :  { %v2359_v7 = vpop.eup %2358 }
 0x36c   :  { %v696_v9 = vrot.slane %v2359_v7, 2  ;;  %v2361_v12 = vpop.eup %2360 }
 0x36e   :  { %v698_v10 = vsub.f32 %v496_v36, %v696_v9 }
 0x370   :  { %v700_v11 = vrot.slane %v698_v10, 6 }
 0x372   :  { %v702_v13 = vmul.f32 %v2361_v12, %v700_v11 }
 0x374   :  { %v703_v14 = vadd.f32 %v2359_v7, %v702_v13 }
 0x376   :  { %v711_v15 = vrot.slane %v703_v14, %v2675_v32  ;;  %v733_v16 = vrot.slane %v703_v14, 2 }
 0x378   :  { %v712_v17 = vcombine.high %v711_v15, %v711_v15  ;;  %v719_v18 = vrot.slane %v711_v15, %v2675_v32  ;;  %2020 = vmatmul.mubr.msk.f32.vlgmr.msra.gmra.mrb[8].mxu1 %vm154_vm3, %v733_v16  ;;  %2143 = vmatmul.mubr.msk.f32.vlgmr.msra.gmra.mrb[8].mxu0 %vm154_vm3, %v733_v16 }
 0x379   :  { %2265 = vmatpush1.bf16.msra.mxu1 %v2599_v41  ;;  %2272 = vmatpush3.bf16.msra.mxu0 %v2609_v47 }
 0x37a   :  { %v726_v20 = vrot.slane %v712_v17, %v2675_v32  ;;  %v727_v21 = vcombine.high %v719_v18, %v719_v18  ;;  %2267 = vmatprep.subr.bf16.mxu1 %v2601_v43  ;;  %2273 = vmatprep.subr.bf16.mxu0 %v2472_v34 }
 0x37b   :  { %1008 = vmatprep.mubr.f32.mxu1 %v2471_v6  ;;  %2153 = vmatprep.mubr.msk.f32.mxu0 %vm2473_vm4, %v2471_v6 }
 0x37c   :  { %v728_v22 = vcombine.high %v726_v20, %v726_v20  ;;  %731 = vst.msk [vmem:[#allocation2 + $0x1] sm:$0x1] %vm522_vm5, %v727_v21 }
 0x37d   :  { %2269 = vmatpush1.bf16.msra.mxu1 %v2621_v50  ;;  %2275 = vmatpush3.bf16.msra.mxu0 %v2626_v51 }
 0x37e   :  { %732 = vst.msk [vmem:[#allocation2 + $0x9] sm:$0x1] %vm522_vm5, %v728_v22  ;;  %2277 = vmatprep.subr.bf16.mxu1 %v2577_v33  ;;  %2284 = vmatprep.subr.bf16.mxu0 %v2472_v34 }
 0x44b   :  { %v802_v23 = vpop.f32.mrb[8].mxu1  ;;  %v873_v24 = vpop.f32.mrb[8].mxu0 }
 0x44c   :  { %v878_v25 = vrot.slane %v802_v23, 4  ;;  %v804_v26 = vpop.f32.mrb[9].mxu1  ;;  %v2144_v27 = vpop.f32.mrb[9].mxu0  ;;  %v897_v38 = vadd.f32 %v2671_v19, %v873_v24 }
 0x44d   :  { %v888_v30 = vrot.slane %v804_v26, 4 }
 0x44e   :  { %v880_v28 = vadd.f32 %v878_v25, %v2654_v61  ;;  %v899_v39 = vrot.slane %v897_v38, 4 }
 0x44f   :  { %v890_v31 = vadd.f32 %v888_v30, %v2656_v0 }
 0x450   :  { %v2022_v29 = vmul.f32 -1.442695, %v880_v28 }
 0x451   :  { %v2023_v37 = vmul.f32 -1.442695, %v890_v31 }
 0x452   :  { %2362 = vpow2.f32 %v2022_v29 }
 0x45c   :  { %v2363_v35 = vpop.eup %2362 }
 0x45d   :  { %v884_v36 = vadd.f32 1.0, %v2363_v35 }
 0x45f   :  { %2364 = vrcp.f32 %v884_v36 }
 0x460   :  { %2366 = vpow2.f32 %v2023_v37 }
 0x469   :  { %v2365_v40 = vpop.eup %2364 }
 0x46a   :  { %v901_v42 = vmul.f32 %v2365_v40, %v899_v39  ;;  %v2367_v45 = vpop.eup %2366 }
 0x46b   :  { %v894_v46 = vadd.f32 1.0, %v2367_v45 }
 0x46c   :  { %v902_v44 = vadd.f32 %v901_v42, %v2660_v3 }
 0x46e   :  { %2368 = vtanh.f32 %v902_v44 }
 0x46f   :  { %2370 = vrcp.f32 %v894_v46 }
 0x478   :  { %v2369_v48 = vpop.eup %2368 }
 0x479   :  { %v905_v49 = vrot.slane %v2369_v48, 2  ;;  %v2371_v54 = vpop.eup %2370 }
 0x47b   :  { %v907_v52 = vsub.f32 %v703_v14, %v905_v49 }
 0x47d   :  { %v909_v53 = vrot.slane %v907_v52, 6 }
 0x47f   :  { %v911_v55 = vmul.f32 %v2371_v54, %v909_v53 }
 0x481   :  { %v912_v56 = vadd.f32 %v2369_v48, %v911_v55 }
 0x483   :  { %v914_v57 = vcombine.high %v912_v56, %v912_v56  ;;  %v941_v58 = vrot.slane %v912_v56, 4 }
 0x485   :  { %v921_v59 = vrot.slane %v914_v57, %v2675_v32  ;;  %2024 = vmatmul.mubr.msk.f32.vlgmr.msra.gmra.mrb[10].mxu1 %vm154_vm3, %v941_v58  ;;  %2154 = vmatmul.mubr.msk.f32.vlgmr.msra.gmra.mrb[10].mxu0 %vm154_vm3, %v941_v58 }
 0x486   :  { %2279 = vmatpush1.bf16.msra.mxu1 %v2599_v41  ;;  %2286 = vmatpush3.bf16.msra.mxu0 %v2609_v47 }
 0x487   :  { %v922_v60 = vcombine.high %v921_v59, %v921_v59  ;;  %v929_v62 = vrot.slane %v921_v59, %v2675_v32  ;;  %2281 = vmatprep.subr.bf16.mxu1 %v2601_v43  ;;  %2287 = vmatprep.subr.bf16.mxu0 %v2472_v34 }
 0x488   :  { %1218 = vmatprep.mubr.f32.mxu1 %v2471_v6  ;;  %2164 = vmatprep.mubr.msk.f32.mxu0 %vm2473_vm4, %v2471_v6 }
 0x489   :  { %v936_v63 = vrot.slane %v922_v60, %v2675_v32  ;;  %939 = vst.msk [vmem:[#allocation2 + $0x2] sm:$0x1] %vm522_vm5, %v929_v62 }
 0x48a   :  { %2283 = vmatpush1.bf16.msra.mxu1 %v2621_v50  ;;  %2289 = vmatpush3.bf16.msra.mxu0 %v2626_v51 }
 0x48b   :  { %940 = vst.msk [vmem:[#allocation2 + $0xa] sm:$0x1] %vm522_vm5, %v936_v63  ;;  %2291 = vmatprep.subr.bf16.mxu1 %v2577_v33  ;;  %2298 = vmatprep.subr.bf16.mxu0 %v2472_v34 }
 0x558   :  { %v1010_v2 = vpop.f32.mrb[10].mxu1  ;;  %v1081_v4 = vpop.f32.mrb[10].mxu0 }
 0x559   :  { %v1086_v7 = vrot.slane %v1010_v2, 2  ;;  %v1012_v9 = vpop.f32.mrb[11].mxu1  ;;  %v2155_v10 = vpop.f32.mrb[11].mxu0  ;;  %v1105_v18 = vadd.f32 %v2671_v19, %v1081_v4 }
 0x55a   :  { %v1096_v13 = vrot.slane %v1012_v9, 2 }
 0x55b   :  { %v1088_v11 = vadd.f32 %v1086_v7, %v2654_v61  ;;  %v1107_v20 = vrot.slane %v1105_v18, 2 }
 0x55c   :  { %v1098_v14 = vadd.f32 %v1096_v13, %v2656_v0 }
 0x55d   :  { %v2026_v12 = vmul.f32 -1.442695, %v1088_v11 }
 0x55e   :  { %v2027_v17 = vmul.f32 -1.442695, %v1098_v14 }
 0x55f   :  { %2372 = vpow2.f32 %v2026_v12 }
 0x569   :  { %v2373_v15 = vpop.eup %2372 }
 0x56a   :  { %v1092_v16 = vadd.f32 1.0, %v2373_v15 }
 0x56c   :  { %2374 = vrcp.f32 %v1092_v16 }
 0x56d   :  { %2376 = vpow2.f32 %v2027_v17 }
 0x576   :  { %v2375_v21 = vpop.eup %2374 }
 0x577   :  { %v1109_v22 = vmul.f32 %v2375_v21, %v1107_v20  ;;  %v2377_v24 = vpop.eup %2376 }
 0x578   :  { %v1102_v61 = vadd.f32 1.0, %v2377_v24 }
 0x579   :  { %v1110_v23 = vadd.f32 %v1109_v22, %v2660_v3 }
 0x57b   :  { %2378 = vtanh.f32 %v1110_v23 }
 0x57c   :  { %2380 = vrcp.f32 %v1102_v61 }
 0x585   :  { %v2379_v25 = vpop.eup %2378 }
 0x586   :  { %v1113_v26 = vrot.slane %v2379_v25, 2  ;;  %v2381_v28 = vpop.eup %2380 }
 0x588   :  { %v1115_v27 = vsub.f32 %v912_v56, %v1113_v26 }
 0x58a   :  { %v1117_v0 = vrot.slane %v1115_v27, 6 }
 0x58c   :  { %v1119_v29 = vmul.f32 %v2381_v28, %v1117_v0 }
 0x58e   :  { %v1120_v30 = vadd.f32 %v2379_v25, %v1119_v29 }
 0x590   :  { %v1122_v31 = vcombine.high %v1120_v30, %v1120_v30  ;;  %v1151_v35 = vrot.slane %v1120_v30, 6 }
 0x592   :  { %v1129_v36 = vrot.slane %v1122_v31, %v2675_v32  ;;  %2028 = vmatmul.mubr.msk.f32.vlgmr.msra.gmra.mrb[12].mxu1 %vm154_vm3, %v1151_v35  ;;  %2165 = vmatmul.mubr.msk.f32.vlgmr.msra.gmra.mrb[12].mxu0 %vm154_vm3, %v1151_v35 }
 0x593   :  { %2293 = vmatpush1.bf16.msra.mxu1 %v2599_v41  ;;  %2300 = vmatpush3.bf16.msra.mxu0 %v2609_v47 }
 0x594   :  { %v1130_v3 = vcombine.high %v1129_v36, %v1129_v36  ;;  %v1137_v37 = vrot.slane %v1129_v36, %v2675_v32  ;;  %2295 = vmatprep.subr.bf16.mxu1 %v2601_v43  ;;  %2301 = vmatprep.subr.bf16.mxu0 %v2472_v34 }
 0x595   :  { %1415 = vmatprep.mubr.f32.mxu1 %v2471_v6  ;;  %2175 = vmatprep.mubr.msk.f32.mxu0 %vm2473_vm4, %v2471_v6 }
 0x596   :  { %v1144_v38 = vrot.slane %v1130_v3, %v2675_v32  ;;  %v1145_v39 = vcombine.high %v1137_v37, %v1137_v37 }
 0x597   :  { %2297 = vmatpush1.bf16.msra.mxu1 %v2621_v50  ;;  %2303 = vmatpush3.bf16.msra.mxu0 %v2626_v51 }
 0x598   :  { %v1146_v40 = vcombine.high %v1144_v38, %v1144_v38  ;;  %1149 = vst.msk [vmem:[#allocation2 + $0x3] sm:$0x1] %vm522_vm5, %v1145_v39  ;;  %2305 = vmatprep.subr.bf16.mxu1 %v2577_v33  ;;  %2312 = vmatprep.subr.bf16.mxu0 %v2472_v34 }
 0x59a   :  { %1150 = vst.msk [vmem:[#allocation2 + $0xb] sm:$0x1] %vm522_vm5, %v1146_v40 }
 0x665   :  { %v1220_v42 = vpop.f32.mrb[12].mxu1  ;;  %v1291_v44 = vpop.f32.mrb[12].mxu0 }
 0x666   :  { %v1295_v45 = vadd.f32 %v1220_v42, %v2662_v5  ;;  %v1222_v46 = vpop.f32.mrb[13].mxu1  ;;  %v2166_v48 = vpop.f32.mrb[13].mxu0  ;;  %v1309_v56 = vadd.f32 %v2671_v19, %v1291_v44 }
 0x667   :  { %v1302_v52 = vadd.f32 %v1222_v46, %v2664_v8 }
 0x668   :  { %v2030_v49 = vmul.f32 -1.442695, %v1295_v45 }
 0x669   :  { %v2031_v55 = vmul.f32 -1.442695, %v1302_v52 }
 0x66a   :  { %2382 = vpow2.f32 %v2030_v49 }
 0x674   :  { %v2383_v53 = vpop.eup %2382 }
 0x675   :  { %v1299_v54 = vadd.f32 1.0, %v2383_v53 }
 0x677   :  { %2384 = vrcp.f32 %v1299_v54 }
 0x678   :  { %2386 = vpow2.f32 %v2031_v55 }
 0x681   :  { %v2385_v57 = vpop.eup %2384 }
 0x682   :  { %v1310_v58 = vmul.f32 %v2385_v57, %v1309_v56  ;;  %v2387_v60 = vpop.eup %2386 }
 0x683   :  { %v1306_v62 = vadd.f32 1.0, %v2387_v60 }
 0x684   :  { %v1311_v59 = vadd.f32 %v1310_v58, %v2658_v1 }
 0x686   :  { %2388 = vtanh.f32 %v1311_v59 }
 0x687   :  { %2390 = vrcp.f32 %v1306_v62 }
 0x690   :  { %v2389_v63 = vpop.eup %2388 }
 0x691   :  { %v1314_v2 = vrot.slane %v2389_v63, 2  ;;  %v2391_v9 = vpop.eup %2390 }
 0x693   :  { %v1316_v4 = vsub.f32 %v1120_v30, %v1314_v2 }
 0x695   :  { %v1318_v7 = vrot.slane %v1316_v4, 6 }
 0x697   :  { %v1320_v10 = vmul.f32 %v2391_v9, %v1318_v7 }
 0x699   :  { %v1321_v11 = vadd.f32 %v2389_v63, %v1320_v10 }
 0x69b   :  { %v1329_v12 = vrot.slane %v1321_v11, %v2675_v32  ;;  %2032 = vmatmul.mubr.msk.f32.vlgmr.msra.gmra.mrb[14].mxu1 %vm154_vm3, %v1321_v11  ;;  %2176 = vmatmul.mubr.msk.f32.vlgmr.msra.gmra.mrb[14].mxu0 %vm154_vm3, %v1321_v11 }
 0x69c   :  { %2307 = vmatpush1.bf16.msra.mxu1 %v2599_v41  ;;  %2314 = vmatpush3.bf16.msra.mxu0 %v2609_v47 }
 0x69d   :  { %v1330_v13 = vcombine.high %v1329_v12, %v1329_v12  ;;  %v1337_v14 = vrot.slane %v1329_v12, %v2675_v32  ;;  %2309 = vmatprep.subr.bf16.mxu1 %v2601_v43  ;;  %2315 = vmatprep.subr.bf16.mxu0 %v2472_v34 }
 0x69e   :  { %1624 = vmatprep.mubr.f32.mxu1 %v2471_v6  ;;  %2186 = vmatprep.mubr.msk.f32.mxu0 %vm2473_vm4, %v2471_v6 }
 0x69f   :  { %v1344_v15 = vrot.slane %v1330_v13, %v2675_v32  ;;  %1347 = vst.msk [vmem:[#allocation2 + $0x4] sm:$0x1] %vm522_vm5, %v1337_v14 }
 0x6a0   :  { %2311 = vmatpush1.bf16.msra.mxu1 %v2621_v50  ;;  %2317 = vmatpush3.bf16.msra.mxu0 %v2626_v51 }
 0x6a1   :  { %1348 = vst.msk [vmem:[#allocation2 + $0xc] sm:$0x1] %vm522_vm5, %v1344_v15  ;;  %2319 = vmatprep.subr.bf16.mxu1 %v2577_v33  ;;  %2326 = vmatprep.subr.bf16.mxu0 %v2472_v34 }
 0x76e   :  { %v1417_v16 = vpop.f32.mrb[14].mxu1  ;;  %v1488_v17 = vpop.f32.mrb[14].mxu0 }
 0x76f   :  { %v1493_v18 = vrot.slane %v1417_v16, 6  ;;  %v1419_v20 = vpop.f32.mrb[15].mxu1  ;;  %v2177_v21 = vpop.f32.mrb[15].mxu0  ;;  %v1512_v33 = vadd.f32 %v2671_v19, %v1488_v17 }
 0x770   :  { %v1503_v24 = vrot.slane %v1419_v20, 6 }
 0x771   :  { %v1495_v22 = vadd.f32 %v1493_v18, %v2662_v5  ;;  %v1514_v0 = vrot.slane %v1512_v33, 6 }
 0x772   :  { %v1505_v61 = vadd.f32 %v1503_v24, %v2664_v8 }
 0x773   :  { %v2034_v23 = vmul.f32 -1.442695, %v1495_v22 }
 0x774   :  { %v2035_v27 = vmul.f32 -1.442695, %v1505_v61 }
 0x775   :  { %2392 = vpow2.f32 %v2034_v23 }
 0x77f   :  { %v2393_v25 = vpop.eup %2392 }
 0x780   :  { %v1499_v26 = vadd.f32 1.0, %v2393_v25 }
 0x782   :  { %2394 = vrcp.f32 %v1499_v26 }
 0x783   :  { %2396 = vpow2.f32 %v2035_v27 }
 0x78c   :  { %v2395_v28 = vpop.eup %2394 }
 0x78d   :  { %v1516_v29 = vmul.f32 %v2395_v28, %v1514_v0  ;;  %v2397_v31 = vpop.eup %2396 }
 0x78e   :  { %v1509_v35 = vadd.f32 1.0, %v2397_v31 }
 0x78f   :  { %v1517_v30 = vadd.f32 %v1516_v29, %v2658_v1 }
 0x791   :  { %2398 = vtanh.f32 %v1517_v30 }
 0x792   :  { %2400 = vrcp.f32 %v1509_v35 }
 0x79b   :  { %v2399_v36 = vpop.eup %2398 }
 0x79c   :  { %v1520_v3 = vrot.slane %v2399_v36, 2  ;;  %v2401_v39 = vpop.eup %2400 }
 0x79e   :  { %v1522_v37 = vsub.f32 %v1321_v11, %v1520_v3 }
 0x7a0   :  { %v1524_v38 = vrot.slane %v1522_v37, 6 }
 0x7a2   :  { %v1526_v40 = vmul.f32 %v2401_v39, %v1524_v38 }
 0x7a4   :  { %v1527_v42 = vadd.f32 %v2399_v36, %v1526_v40 }
 0x7a6   :  { %v1535_v44 = vrot.slane %v1527_v42, %v2675_v32  ;;  %v1557_v45 = vrot.slane %v1527_v42, 2 }
 0x7a8   :  { %v1536_v46 = vcombine.high %v1535_v44, %v1535_v44  ;;  %v1543_v48 = vrot.slane %v1535_v44, %v2675_v32  ;;  %2036 = vmatmul.mubr.msk.f32.vlgmr.msra.gmra.mrb[16].mxu1 %vm154_vm3, %v1557_v45  ;;  %2187 = vmatmul.mubr.msk.f32.vlgmr.msra.gmra.mrb[16].mxu0 %vm154_vm3, %v1557_v45 }
 0x7a9   :  { %2321 = vmatpush1.bf16.msra.mxu1 %v2599_v41  ;;  %2328 = vmatpush3.bf16.msra.mxu0 %v2609_v47 }
 0x7aa   :  { %v1550_v49 = vrot.slane %v1536_v46, %v2675_v32  ;;  %v1551_v52 = vcombine.high %v1543_v48, %v1543_v48  ;;  %2323 = vmatprep.subr.bf16.mxu1 %v2601_v43  ;;  %2329 = vmatprep.subr.bf16.mxu0 %v2472_v34 }
 0x7ab   :  { %1832 = vmatprep.mubr.f32.mxu1 %v2471_v6  ;;  %2197 = vmatprep.mubr.msk.f32.mxu0 %vm2473_vm4, %v2471_v6 }
 0x7ac   :  { %v1552_v53 = vcombine.high %v1550_v49, %v1550_v49  ;;  %1555 = vst.msk [vmem:[#allocation2 + $0x5] sm:$0x1] %vm522_vm5, %v1551_v52 }
 0x7ad   :  { %2325 = vmatpush1.bf16.msra.mxu1 %v2621_v50  ;;  %2331 = vmatpush3.bf16.msra.mxu0 %v2626_v51 }
 0x7ae   :  { %1556 = vst.msk [vmem:[#allocation2 + $0xd] sm:$0x1] %vm522_vm5, %v1552_v53 }
 0x87b   :  { %v1626_v41 = vpop.f32.mrb[16].mxu1  ;;  %v1697_v47 = vpop.f32.mrb[16].mxu0 }
 0x87c   :  { %v1702_v54 = vrot.slane %v1626_v41, 4  ;;  %v1628_v43 = vpop.f32.mrb[17].mxu1  ;;  %v2188_v55 = vpop.f32.mrb[17].mxu0  ;;  %v1721_v51 = vadd.f32 %v2671_v19, %v1697_v47 }
 0x87d   :  { %v1712_v57 = vrot.slane %v1628_v43, 4 }
 0x87e   :  { %v1704_v34 = vadd.f32 %v1702_v54, %v2662_v5  ;;  %v1723_v60 = vrot.slane %v1721_v51, 4 }
 0x87f   :  { %v1714_v6 = vadd.f32 %v1712_v57, %v2664_v8 }
 0x880   :  { %v2038_v56 = vmul.f32 -1.442695, %v1704_v34 }
 0x881   :  { %v2039_v50 = vmul.f32 -1.442695, %v1714_v6 }
 0x882   :  { %2402 = vpow2.f32 %v2038_v56 }
 0x88c   :  { %v2403_v58 = vpop.eup %2402 }
 0x88d   :  { %v1708_v59 = vadd.f32 1.0, %v2403_v58 }
 0x88f   :  { %2404 = vrcp.f32 %v1708_v59 }
 0x890   :  { %2406 = vpow2.f32 %v2039_v50 }
 0x899   :  { %v2405_v62 = vpop.eup %2404 }
 0x89a   :  { %v1725_v63 = vmul.f32 %v2405_v62, %v1723_v60  ;;  %v2407_v4 = vpop.eup %2406 }
 0x89b   :  { %v1718_v7 = vadd.f32 1.0, %v2407_v4 }
 0x89c   :  { %v1726_v2 = vadd.f32 %v1725_v63, %v2658_v1 }
 0x89e   :  { %2408 = vtanh.f32 %v1726_v2 }
 0x89f   :  { %2410 = vrcp.f32 %v1718_v7 }
 0x8a8   :  { %v2409_v9 = vpop.eup %2408 }
 0x8a9   :  { %v1729_v10 = vrot.slane %v2409_v9, 2  ;;  %v2411_v13 = vpop.eup %2410 }
 0x8ab   :  { %v1731_v11 = vsub.f32 %v1527_v42, %v1729_v10 }
 0x8ad   :  { %v1733_v12 = vrot.slane %v1731_v11, 6 }
 0x8af   :  { %v1735_v14 = vmul.f32 %v2411_v13, %v1733_v12 }
 0x8b1   :  { %v1736_v15 = vadd.f32 %v2409_v9, %v1735_v14 }
 0x8b3   :  { %v1738_v16 = vcombine.high %v1736_v15, %v1736_v15  ;;  %v1765_v17 = vrot.slane %v1736_v15, 4 }
 0x8b5   :  { %v1745_v18 = vrot.slane %v1738_v16, %v2675_v32  ;;  %2040 = vmatmul.mubr.msk.f32.vlgmr.msra.gmra.mrb[18].mxu1 %vm154_vm3, %v1765_v17  ;;  %2198 = vmatmul.mubr.msk.f32.vlgmr.msra.gmra.mrb[18].mxu0 %vm154_vm3, %v1765_v17 }
 0x8b7   :  { %v1746_v20 = vcombine.high %v1745_v18, %v1745_v18  ;;  %v1753_v21 = vrot.slane %v1745_v18, %v2675_v32 }
 0x8b9   :  { %v1760_v22 = vrot.slane %v1746_v20, %v2675_v32  ;;  %1763 = vst.msk [vmem:[#allocation2 + $0x6] sm:$0x1] %vm522_vm5, %v1753_v21 }
 0x8bb   :  { %1764 = vst.msk [vmem:[#allocation2 + $0xe] sm:$0x1] %vm522_vm5, %v1760_v22 }
 0x988   :  { %v1834_v23 = vpop.f32.mrb[18].mxu1  ;;  %v1905_v24 = vpop.f32.mrb[18].mxu0 }
 0x989   :  { %v1910_v61 = vrot.slane %v1834_v23, 2  ;;  %v1836_v25 = vpop.f32.mrb[19].mxu1  ;;  %v2199_v26 = vpop.f32.mrb[19].mxu0  ;;  %v1929_v35 = vadd.f32 %v2671_v19, %v1905_v24 }
 0x98a   :  { %v1920_v0 = vrot.slane %v1836_v25, 2 }
 0x98b   :  { %v1912_v27 = vadd.f32 %v1910_v61, %v2662_v5  ;;  %v1931_v36 = vrot.slane %v1929_v35, 2 }
 0x98c   :  { %v1922_v28 = vadd.f32 %v1920_v0, %v2664_v8 }
 0x98d   :  { %v2042_v33 = vmul.f32 -1.442695, %v1912_v27 }
 0x98e   :  { %v2043_v31 = vmul.f32 -1.442695, %v1922_v28 }
 0x98f   :  { %2412 = vpow2.f32 %v2042_v33 }
 0x999   :  { %v2413_v29 = vpop.eup %2412 }
 0x99a   :  { %v1916_v30 = vadd.f32 1.0, %v2413_v29 }
 0x99c   :  { %2414 = vrcp.f32 %v1916_v30 }
 0x99d   :  { %2416 = vpow2.f32 %v2043_v31 }
 0x9a6   :  { %v2415_v3 = vpop.eup %2414 }
 0x9a7   :  { %v1933_v37 = vmul.f32 %v2415_v3, %v1931_v36  ;;  %v2417_v39 = vpop.eup %2416 }
 0x9a8   :  { %v1926_v5 = vadd.f32 1.0, %v2417_v39 }
 0x9a9   :  { %v1934_v38 = vadd.f32 %v1933_v37, %v2658_v1 }
 0x9ab   :  { %2418 = vtanh.f32 %v1934_v38 }
 0x9ac   :  { %2420 = vrcp.f32 %v1926_v5 }
 0x9b5   :  { %v2419_v40 = vpop.eup %2418 }
 0x9b6   :  { %v1937_v42 = vrot.slane %v2419_v40, 2  ;;  %v2421_v45 = vpop.eup %2420 }
 0x9b8   :  { %v1939_v44 = vsub.f32 %v1736_v15, %v1937_v42 }
 0x9ba   :  { %v1941_v8 = vrot.slane %v1939_v44, 6 }
 0x9bc   :  { %v1943_v46 = vmul.f32 %v2421_v45, %v1941_v8 }
 0x9be   :  { %v1944_v48 = vadd.f32 %v2419_v40, %v1943_v46 }
 0x9c0   :  { %v1946_v19 = vcombine.high %v1944_v48, %v1944_v48  ;;  %1976 = vst.msk [vmem:[#allocation4 - $0x6] sm:$0xc0] %vm1975_vm6, %v1944_v48 }
 0x9c1   :  { %2433 = shalt.err (!%p2430_p4)
}
 0x9c2   :  { %s2434_s2 = scalar_lea.hbm %s2854_s7, 32 }
 0x9c3   :  { %p2435_p5 = scmp.ne.s32.totalorder %s2854_s7, %s2434_s2  ;;  %p2438_p6 = scmp.lt.u32.totalorder %s2434_s2, %s2854_s7 }
 0x9c5   :  { %p2440_p7 = pnand %p2438_p6, %p2435_p5 }
 0x9c7   :  { %2443 = shalt.err (!%p2440_p7)
}
 0x9c8   :  { %1998 = dma.vmem_to_hbm [thread:$0]  %s1996_s8, 32, %s2854_s7, [#allocation5]   ;;  %v1953_v1 = vrot.slane %v1946_v19, %v2675_v32 }
 0x9c9   :  { %s2476_s16 = smov [#allocation2]  }
 0x9ca   :  { %v1954_v49 = vcombine.high %v1953_v1, %v1953_v1  ;;  %v1961_v52 = vrot.slane %v1953_v1, %v2675_v32  ;;  %s1982_s17 = sshll.u32 %s2476_s16, 4  ;;  %s1983_s17 = int_to_ptr.vmem [resolvable:$true] %s1982_s17 }
 0x9cb   :  { %s2444_s18 = scalar_lea.vmem %s1983_s17, 256  ;;  %p2449_p9 = scmp.lt.s32.totalorder %s1983_s17, %s1983_s17 }
 0x9cc   :  { %v1968_v53 = vrot.slane %v1954_v49, %v2675_v32  ;;  %v1969_v41 = vcombine.high %v1961_v52, %v1961_v52  ;;  %p2445_p8 = scmp.ne.s32.totalorder %s1983_s17, %s2444_s18  ;;  %p2450_p10 = scmp.lt.s32.totalorder %s2444_s18, %s2444_s18 }
 0x9ce   :  { %v1970_v47 = vcombine.high %v1968_v53, %v1968_v53  ;;  %1973 = vst.msk [vmem:[#allocation2 + $0x7] sm:$0x1] %vm522_vm5, %v1969_v41  ;;  %p2451_p11 = por %p2450_p10, %p2449_p9 }
 0x9d0   :  { %1974 = vst.msk [vmem:[#allocation2 + $0xf] sm:$0x1] %vm522_vm5, %v1970_v47  ;;  %p2452_p12 = pnand %p2451_p11, %p2445_p8 }
 0x9d2   :  { %2455 = shalt.err (!%p2452_p12)
}
 0x9d3   :  { %s2456_s20 = scalar_lea.hbm %s2853_s6, 256 }
 0x9d4   :  { %p2457_p13 = scmp.ne.s32.totalorder %s2853_s6, %s2456_s20  ;;  %p2460_p0 = scmp.lt.u32.totalorder %s2456_s20, %s2853_s6 }
 0x9d6   :  { %p2462_p1 = pnand %p2460_p0, %p2457_p13 }
 0x9d8   :  { %2465 = shalt.err (!%p2462_p1)
}
 0x9d9   :  { %s2477_s25 = smov 128   ;;  %s2478_s26 = smov 8  }
 0x9da   :  { %1988 = dma.vmem_to_hbm [thread:$0]  %s1983_s17, 256, %s2853_s6, [#allocation3], %s2477_s25, %s2477_s25, %s2478_s26  }
 0x9db   :  { %2466 = dma.done.wait [#allocation3], 256  }
 0x9dc   :  { %2467 = vsyncadd [#allocation3], 4294967040 }
 0x9dd   :  { %2468 = dma.done.wait [#allocation5], 32  }
 0x9de   :  { %2469 = vsyncadd [#allocation5], 4294967264 }
 0x9df   :  { %2005 = vsyncpa [#allocation3], 1 }
 0x9e0   :  { %2006 = vsyncpa [#allocation5], 1 }

</bundles_post_ra>
